<compile_context>
chip_gen: v7x
topology: tpu7x:2x2x1
jax: 0.10.0
libtpu: 0.0.40
codegen_flags: <defaults>
</compile_context>

<pallas_src>
import functools

import jax
import jax.numpy as jnp
from jax import lax
from jax.experimental import pallas as pl
from jax.experimental.pallas import tpu as pltpu


def _round_up(x, m):
    return (x + m - 1) // m * m


_VMEM_LIMIT_BYTES = 48 * 1024 * 1024    # <= v7x 64 MiB physical, > v5e/v6e defaults
_VMEM_BUDGET_BYTES = 40 * 1024 * 1024   # target working set when sizing blocks


def _vmem_bytes_estimate(bb, Lp, Ep):
    """Rough per-grid-step VMEM bytes (conservative, all f32-sized)."""
    a_blk = bb * Lp * Lp * 4
    h_blk = bb * Lp * Ep * 4
    io = 2 * (a_blk + h_blk) + 2 * h_blk          # double-buffered in + out blocks
    w = 2 * (2 * Ep * Ep * 4 + Ep * 4)            # two weight mats + bias
    tmp = a_blk + 6 * bb * Lp * Ep * 4            # in-kernel live f32 temporaries
    return io + w + tmp


def _pick_batch_block(B, Lp, Ep):
    """Largest divisor of B giving >= min(B,4) grid steps within the VMEM budget."""
    min_grid = min(B, 4)
    feasible = []
    for d in range(1, B + 1):
        if B % d:
            continue
        if B // d < min_grid:
            continue
        if _vmem_bytes_estimate(d, Lp, Ep) > _VMEM_BUDGET_BYTES:
            continue
        feasible.append(d)
    if not feasible:
        return 1
    # Prefer full 128-row M tiles for the flattened (bb*Lp, Ep) matmuls.
    pref = [d for d in feasible if (d * Lp) % 128 == 0]
    return max(pref) if pref else max(feasible)


def _gnn_kernel(a_ref, h_ref, wih_ref, whh_ref, b_ref, o_ref, *,
                step, matmul_dtype, mp_on_vpu):
    """One grid step: a block of `bb` batch elements, all `step` GNN updates.

    a_ref  : (bb, Lp, Lp)  adjacency block (zero-padded rows/cols)
    h_ref  : (bb, Lp, Ep)  initial hidden block (zero-padded)
    wih_ref: (Ep, Ep)      W_ih^T zero-padded
    whh_ref: (Ep, Ep)      W_hh^T zero-padded
    b_ref  : (1, Ep)       b_ih + b_hh zero-padded (f32)
    o_ref  : (bb, Lp, Ep)  final hidden block
    """
    bb, Lp, _ = a_ref.shape
    Ep = h_ref.shape[-1]
    md = matmul_dtype

    # Loaded once per grid step, resident across the whole step loop.
    A = a_ref[...].astype(jnp.float32 if mp_on_vpu else md)   # (bb, Lp, Lp)
    Wih = wih_ref[...].astype(md)                              # (Ep, Ep)
    Whh = whh_ref[...].astype(md)                              # (Ep, Ep)
    bias = b_ref[...].astype(jnp.float32)                      # (1, Ep): broadcast add

    # f32 carry, kept flattened; reshape back only where needed (layout no-op
    # because Lp is a sublane multiple and Ep a lane multiple).
    h0 = h_ref[...].astype(jnp.float32).reshape(bb * Lp, Ep)

    def body(_, h):                                    # h: (bb*Lp, Ep) f32
        h3 = h.reshape(bb, Lp, Ep)
        if mp_on_vpu:
            # m[b,i,:] = sum_j A[b,i,j] * h[b,j,:]  as Lp broadcast-FMAs (VPU).
            m3 = A[:, :, 0:1] * h3[:, 0:1, :]
            for j in range(1, Lp):
                m3 = m3 + A[:, :, j:j + 1] * h3[:, j:j + 1, :]
        else:
            m3 = jnp.einsum("bij,bjd->bid", A, h3.astype(md),
                            preferred_element_type=jnp.float32)
        m_md = m3.reshape(bb * Lp, Ep).astype(md)
        h_md = h.astype(md)
        # Two MXU dots, f32 accumulation, (1, Ep) bias broadcast on the VPU.
        z = (jnp.dot(m_md, Wih, preferred_element_type=jnp.float32)
             + jnp.dot(h_md, Whh, preferred_element_type=jnp.float32)
             + bias)
        return jnp.maximum(z, 0.0)                     # f32 epilogue, carry stays f32

    h = lax.fori_loop(0, step, body, h0,
                      unroll=True if step <= 4 else 2)
    o_ref[...] = h.reshape(bb, Lp, Ep).astype(o_ref.dtype)


def gnn_layer(A, hidden, W_ih, b_ih, W_hh, b_hh, step=1, *,
              batch_block=None, matmul_dtype=None, mp_mode="auto"):
    """GNNLayer.forward.  A: [B, L, L], hidden: [B, L, E] -> [B, L, E].

    matmul_dtype=None (default) keeps exact f32 module semantics (recommended
    on v5e).  matmul_dtype=jnp.bfloat16 runs the two Linear matmuls with bf16
    operands + f32 accumulation: approximate, MXU-native on v6e/v7x.
    mp_mode: "auto" | "vpu" | "mxu" selects how A @ hidden is computed.
    """
    B, L, E = hidden.shape
    assert A.shape == (B, L, L)
    out_dtype = hidden.dtype
    md = jnp.dtype(jnp.float32) if matmul_dtype is None else jnp.dtype(matmul_dtype)

    # Lane-dense / sublane-dense padding.
    sub = 8 if md == jnp.dtype(jnp.float32) else 16
    Lp = _round_up(L, sub)
    Ep = _round_up(E, 128)

    A_in = A if Lp == L else jnp.pad(A, ((0, 0), (0, Lp - L), (0, Lp - L)))
    h_in = hidden if (Lp == L and Ep == E) else jnp.pad(
        hidden, ((0, 0), (0, Lp - L), (0, Ep - E)))

    # Small weight/bias prep (zero-padded); kept f32 in HBM, cast in-kernel.
    wih_t = jnp.zeros((Ep, Ep), jnp.float32).at[:E, :E].set(W_ih.T.astype(jnp.float32))
    whh_t = jnp.zeros((Ep, Ep), jnp.float32).at[:E, :E].set(W_hh.T.astype(jnp.float32))
    bc = jnp.zeros((1, Ep), jnp.float32).at[0, :E].set(
        (b_ih + b_hh).astype(jnp.float32))

    if batch_block is None:
        bb = _pick_batch_block(B, Lp, Ep)
    else:
        bb = int(batch_block)
    assert B % bb == 0, "batch_block must divide the batch size"

    if mp_mode == "auto":
        mp_on_vpu = Lp <= 32
    else:
        mp_on_vpu = (mp_mode == "vpu")

    kernel = functools.partial(_gnn_kernel, step=int(step), matmul_dtype=md,
                               mp_on_vpu=mp_on_vpu)

    out = pl.pallas_call(
        kernel,
        out_shape=jax.ShapeDtypeStruct((B, Lp, Ep), out_dtype),
        grid_spec=pltpu.PrefetchScalarGridSpec(
            num_scalar_prefetch=0,
            grid=(B // bb,),
            in_specs=[
                pl.BlockSpec((bb, Lp, Lp), lambda i: (i, 0, 0)),
                pl.BlockSpec((bb, Lp, Ep), lambda i: (i, 0, 0)),
                pl.BlockSpec((Ep, Ep), lambda i: (0, 0)),
                pl.BlockSpec((Ep, Ep), lambda i: (0, 0)),
                pl.BlockSpec((1, Ep), lambda i: (0, 0)),
            ],
            out_specs=pl.BlockSpec((bb, Lp, Ep), lambda i: (i, 0, 0)),
        ),
        compiler_params=pltpu.CompilerParams(
            dimension_semantics=("parallel",),
            vmem_limit_bytes=_VMEM_LIMIT_BYTES),
    )(A_in, h_in, wih_t, whh_t, bc)

    if Lp != L or Ep != E:
        out = out[:, :L, :E]
    return out


def _reference(A, hidden, W_ih, b_ih, W_hh, b_hh, step=1, matmul_dtype=None):
    """Pure-JAX reference.  matmul_dtype=None -> exact f32 module semantics;
    bf16 mirrors the kernel's small-L bf16 path (f32 message passing, bf16
    Linear operands, f32 accumulation)."""
    md = jnp.float32 if matmul_dtype is None else matmul_dtype
    hi = lax.Precision.HIGHEST
    h = hidden.astype(jnp.float32)
    A32 = A.astype(jnp.float32)
    wih_t = W_ih.T.astype(md)
    whh_t = W_hh.T.astype(md)
    b = (b_ih + b_hh).astype(jnp.float32)
    for _ in range(step):
        m = jnp.matmul(A32, h, precision=hi)
        z = (jnp.matmul(m.astype(md), wih_t,
                        preferred_element_type=jnp.float32, precision=hi)
             + jnp.matmul(h.astype(md), whh_t,
                          preferred_element_type=jnp.float32, precision=hi)
             + b)
        h = jnp.maximum(z, 0.0)
    return h.astype(hidden.dtype)


if __name__ == "__main__":
    B, L, E = 2, 8, 32
    step = 2   # exercises the in-kernel step loop

    key = jax.random.PRNGKey(0)
    k_a, k_h, k_wih, k_bih, k_whh, k_bhh = jax.random.split(key, 6)

    A = jax.random.uniform(k_a, (B, L, L), dtype=jnp.float32)
    hidden = jax.random.normal(k_h, (B, L, E), dtype=jnp.float32)

    bound = 1.0 / (E ** 0.5)
    W_ih = jax.random.uniform(k_wih, (E, E), minval=-bound, maxval=bound, dtype=jnp.float32)
    b_ih = jax.random.uniform(k_bih, (E,), minval=-bound, maxval=bound, dtype=jnp.float32)
    W_hh = jax.random.uniform(k_whh, (E, E), minval=-bound, maxval=bound, dtype=jnp.float32)
    b_hh = jax.random.uniform(k_bhh, (E,), minval=-bound, maxval=bound, dtype=jnp.float32)

    ref = _reference(A, hidden, W_ih, b_ih, W_hh, b_hh, step=step)

    # Default f32 path (VPU message passing for small L): exact module semantics.
    out = jax.block_until_ready(
        gnn_layer(A, hidden, W_ih, b_ih, W_hh, b_hh, step=step))
    assert out.shape == (B, L, E)
    assert jnp.allclose(out, ref, atol=1e-4, rtol=1e-4), "f32 (vpu mp) mismatch"

    # Forced MXU message-passing path (used automatically for larger L), f32.
    out_mxu = jax.block_until_ready(
        gnn_layer(A, hidden, W_ih, b_ih, W_hh, b_hh, step=step, mp_mode="mxu"))
    assert jnp.allclose(out_mxu, ref, atol=1e-4, rtol=1e-4), "f32 (mxu mp) mismatch"

    # Optional bf16 Linear-operand path (approximate; v6e/v7x MXU-native).
    out_bf16 = jax.block_until_ready(
        gnn_layer(A, hidden, W_ih, b_ih, W_hh, b_hh, step=step,
                  matmul_dtype=jnp.bfloat16))
    ref_bf16 = _reference(A, hidden, W_ih, b_ih, W_hh, b_hh, step=step,
                          matmul_dtype=jnp.bfloat16)
    assert out_bf16.shape == (B, L, E)
    assert jnp.allclose(out_bf16, ref_bf16, atol=2e-2, rtol=2e-2), "bf16 mismatch"

    print("KERNEL_OK")
</pallas_src>

<mosaic_0001>
module attributes {stable_mosaic.version = 11 : i64} {
  func.func @_gnn_kernel(%arg0: i32, %arg1: memref<1x8x8xf32, #tpu.memory_space<vmem>>, %arg2: memref<1x8x128xf32, #tpu.memory_space<vmem>>, %arg3: memref<128x128xf32, #tpu.memory_space<vmem>>, %arg4: memref<128x128xf32, #tpu.memory_space<vmem>>, %arg5: memref<1x128xf32, #tpu.memory_space<vmem>>, %arg6: memref<1x8x128xf32, #tpu.memory_space<vmem>>) attributes {dimension_semantics = [#tpu.dimension_semantics<parallel>], iteration_bounds = array<i64: 2>, scalar_prefetch = 0 : i64, scratch_operands = 0 : i64, tpu.core_type = #tpu.core_type<tc>, window_params = [{transform_indices = @transform_0, window_bounds = array<i64: 1, 8, 8>}, {transform_indices = @transform_1, window_bounds = array<i64: 1, 8, 128>}, {pipeline_mode = #tpu.pipeline_mode<synchronous>, transform_indices = @transform_2, window_bounds = array<i64: 128, 128>}, {pipeline_mode = #tpu.pipeline_mode<synchronous>, transform_indices = @transform_3, window_bounds = array<i64: 128, 128>}, {pipeline_mode = #tpu.pipeline_mode<synchronous>, transform_indices = @transform_4, window_bounds = array<i64: 1, 128>}, {transform_indices = @transform_5, window_bounds = array<i64: 1, 8, 128>}]} {
    %c0 = arith.constant 0 : index
    %c0_0 = arith.constant 0 : index
    %c0_1 = arith.constant 0 : index
    %0 = vector.load %arg1[%c0, %c0_0, %c0_1] : memref<1x8x8xf32, #tpu.memory_space<vmem>>, vector<1x8x8xf32>
    %c0_2 = arith.constant 0 : index
    %c0_3 = arith.constant 0 : index
    %1 = vector.load %arg3[%c0_2, %c0_3] : memref<128x128xf32, #tpu.memory_space<vmem>>, vector<128x128xf32>
    %c0_4 = arith.constant 0 : index
    %c0_5 = arith.constant 0 : index
    %2 = vector.load %arg4[%c0_4, %c0_5] : memref<128x128xf32, #tpu.memory_space<vmem>>, vector<128x128xf32>
    %c0_6 = arith.constant 0 : index
    %c0_7 = arith.constant 0 : index
    %3 = vector.load %arg5[%c0_6, %c0_7] : memref<1x128xf32, #tpu.memory_space<vmem>>, vector<1x128xf32>
    %c0_8 = arith.constant 0 : index
    %c0_9 = arith.constant 0 : index
    %c0_10 = arith.constant 0 : index
    %4 = vector.load %arg2[%c0_8, %c0_9, %c0_10] : memref<1x8x128xf32, #tpu.memory_space<vmem>>, vector<1x8x128xf32>
    %5 = vector.shape_cast %4 : vector<1x8x128xf32> to vector<8x128xf32>
    %c0_i32 = arith.constant 0 : i32
    %6 = vector.shape_cast %5 : vector<8x128xf32> to vector<1x8x128xf32>
    %7 = vector.extract_strided_slice %0 {offsets = [0, 0, 0], sizes = [1, 8, 1], strides = [1, 1, 1]} : vector<1x8x8xf32> to vector<1x8x1xf32>
    %8 = vector.extract_strided_slice %6 {offsets = [0, 0, 0], sizes = [1, 1, 128], strides = [1, 1, 1]} : vector<1x8x128xf32> to vector<1x1x128xf32>
    %9 = vector.broadcast %7 : vector<1x8x1xf32> to vector<1x8x128xf32>
    %10 = vector.broadcast %8 : vector<1x1x128xf32> to vector<1x8x128xf32>
    %11 = arith.mulf %9, %10 : vector<1x8x128xf32>
    %12 = vector.extract_strided_slice %0 {offsets = [0, 0, 1], sizes = [1, 8, 1], strides = [1, 1, 1]} : vector<1x8x8xf32> to vector<1x8x1xf32>
    %13 = vector.extract_strided_slice %6 {offsets = [0, 1, 0], sizes = [1, 1, 128], strides = [1, 1, 1]} : vector<1x8x128xf32> to vector<1x1x128xf32>
    %14 = vector.broadcast %12 : vector<1x8x1xf32> to vector<1x8x128xf32>
    %15 = vector.broadcast %13 : vector<1x1x128xf32> to vector<1x8x128xf32>
    %16 = arith.mulf %14, %15 : vector<1x8x128xf32>
    %17 = arith.addf %11, %16 : vector<1x8x128xf32>
    %18 = vector.extract_strided_slice %0 {offsets = [0, 0, 2], sizes = [1, 8, 1], strides = [1, 1, 1]} : vector<1x8x8xf32> to vector<1x8x1xf32>
    %19 = vector.extract_strided_slice %6 {offsets = [0, 2, 0], sizes = [1, 1, 128], strides = [1, 1, 1]} : vector<1x8x128xf32> to vector<1x1x128xf32>
    %20 = vector.broadcast %18 : vector<1x8x1xf32> to vector<1x8x128xf32>
    %21 = vector.broadcast %19 : vector<1x1x128xf32> to vector<1x8x128xf32>
    %22 = arith.mulf %20, %21 : vector<1x8x128xf32>
    %23 = arith.addf %17, %22 : vector<1x8x128xf32>
    %24 = vector.extract_strided_slice %0 {offsets = [0, 0, 3], sizes = [1, 8, 1], strides = [1, 1, 1]} : vector<1x8x8xf32> to vector<1x8x1xf32>
    %25 = vector.extract_strided_slice %6 {offsets = [0, 3, 0], sizes = [1, 1, 128], strides = [1, 1, 1]} : vector<1x8x128xf32> to vector<1x1x128xf32>
    %26 = vector.broadcast %24 : vector<1x8x1xf32> to vector<1x8x128xf32>
    %27 = vector.broadcast %25 : vector<1x1x128xf32> to vector<1x8x128xf32>
    %28 = arith.mulf %26, %27 : vector<1x8x128xf32>
    %29 = arith.addf %23, %28 : vector<1x8x128xf32>
    %30 = vector.extract_strided_slice %0 {offsets = [0, 0, 4], sizes = [1, 8, 1], strides = [1, 1, 1]} : vector<1x8x8xf32> to vector<1x8x1xf32>
    %31 = vector.extract_strided_slice %6 {offsets = [0, 4, 0], sizes = [1, 1, 128], strides = [1, 1, 1]} : vector<1x8x128xf32> to vector<1x1x128xf32>
    %32 = vector.broadcast %30 : vector<1x8x1xf32> to vector<1x8x128xf32>
    %33 = vector.broadcast %31 : vector<1x1x128xf32> to vector<1x8x128xf32>
    %34 = arith.mulf %32, %33 : vector<1x8x128xf32>
    %35 = arith.addf %29, %34 : vector<1x8x128xf32>
    %36 = vector.extract_strided_slice %0 {offsets = [0, 0, 5], sizes = [1, 8, 1], strides = [1, 1, 1]} : vector<1x8x8xf32> to vector<1x8x1xf32>
    %37 = vector.extract_strided_slice %6 {offsets = [0, 5, 0], sizes = [1, 1, 128], strides = [1, 1, 1]} : vector<1x8x128xf32> to vector<1x1x128xf32>
    %38 = vector.broadcast %36 : vector<1x8x1xf32> to vector<1x8x128xf32>
    %39 = vector.broadcast %37 : vector<1x1x128xf32> to vector<1x8x128xf32>
    %40 = arith.mulf %38, %39 : vector<1x8x128xf32>
    %41 = arith.addf %35, %40 : vector<1x8x128xf32>
    %42 = vector.extract_strided_slice %0 {offsets = [0, 0, 6], sizes = [1, 8, 1], strides = [1, 1, 1]} : vector<1x8x8xf32> to vector<1x8x1xf32>
    %43 = vector.extract_strided_slice %6 {offsets = [0, 6, 0], sizes = [1, 1, 128], strides = [1, 1, 1]} : vector<1x8x128xf32> to vector<1x1x128xf32>
    %44 = vector.broadcast %42 : vector<1x8x1xf32> to vector<1x8x128xf32>
    %45 = vector.broadcast %43 : vector<1x1x128xf32> to vector<1x8x128xf32>
    %46 = arith.mulf %44, %45 : vector<1x8x128xf32>
    %47 = arith.addf %41, %46 : vector<1x8x128xf32>
    %48 = vector.extract_strided_slice %0 {offsets = [0, 0, 7], sizes = [1, 8, 1], strides = [1, 1, 1]} : vector<1x8x8xf32> to vector<1x8x1xf32>
    %49 = vector.extract_strided_slice %6 {offsets = [0, 7, 0], sizes = [1, 1, 128], strides = [1, 1, 1]} : vector<1x8x128xf32> to vector<1x1x128xf32>
    %50 = vector.broadcast %48 : vector<1x8x1xf32> to vector<1x8x128xf32>
    %51 = vector.broadcast %49 : vector<1x1x128xf32> to vector<1x8x128xf32>
    %52 = arith.mulf %50, %51 : vector<1x8x128xf32>
    %53 = arith.addf %47, %52 : vector<1x8x128xf32>
    %54 = vector.shape_cast %53 : vector<1x8x128xf32> to vector<8x128xf32>
    %cst = arith.constant dense<0.000000e+00> : vector<8x128xf32>
    %55 = tpu.matmul %54, %1, %cst {dimension_numbers = #tpu.dot_dimension_numbers<[1], [0], [0], [1], [0, 0, 1, 1], [], []>} : vector<8x128xf32>, vector<128x128xf32>, vector<8x128xf32> -> vector<8x128xf32>
    %cst_11 = arith.constant dense<0.000000e+00> : vector<8x128xf32>
    %56 = tpu.matmul %5, %2, %cst_11 {dimension_numbers = #tpu.dot_dimension_numbers<[1], [0], [0], [1], [0, 0, 1, 1], [], []>} : vector<8x128xf32>, vector<128x128xf32>, vector<8x128xf32> -> vector<8x128xf32>
    %57 = arith.addf %55, %56 : vector<8x128xf32>
    %58 = vector.broadcast %3 : vector<1x128xf32> to vector<8x128xf32>
    %59 = arith.addf %57, %58 : vector<8x128xf32>
    %cst_12 = arith.constant 0.000000e+00 : f32
    %60 = vector.broadcast %cst_12 : f32 to vector<8x128xf32>
    %61 = arith.maximumf %59, %60 : vector<8x128xf32>
    %c1_i32 = arith.constant 1 : i32
    %62 = vector.shape_cast %61 : vector<8x128xf32> to vector<1x8x128xf32>
    %63 = vector.extract_strided_slice %0 {offsets = [0, 0, 0], sizes = [1, 8, 1], strides = [1, 1, 1]} : vector<1x8x8xf32> to vector<1x8x1xf32>
    %64 = vector.extract_strided_slice %62 {offsets = [0, 0, 0], sizes = [1, 1, 128], strides = [1, 1, 1]} : vector<1x8x128xf32> to vector<1x1x128xf32>
    %65 = vector.broadcast %63 : vector<1x8x1xf32> to vector<1x8x128xf32>
    %66 = vector.broadcast %64 : vector<1x1x128xf32> to vector<1x8x128xf32>
    %67 = arith.mulf %65, %66 : vector<1x8x128xf32>
    %68 = vector.extract_strided_slice %0 {offsets = [0, 0, 1], sizes = [1, 8, 1], strides = [1, 1, 1]} : vector<1x8x8xf32> to vector<1x8x1xf32>
    %69 = vector.extract_strided_slice %62 {offsets = [0, 1, 0], sizes = [1, 1, 128], strides = [1, 1, 1]} : vector<1x8x128xf32> to vector<1x1x128xf32>
    %70 = vector.broadcast %68 : vector<1x8x1xf32> to vector<1x8x128xf32>
    %71 = vector.broadcast %69 : vector<1x1x128xf32> to vector<1x8x128xf32>
    %72 = arith.mulf %70, %71 : vector<1x8x128xf32>
    %73 = arith.addf %67, %72 : vector<1x8x128xf32>
    %74 = vector.extract_strided_slice %0 {offsets = [0, 0, 2], sizes = [1, 8, 1], strides = [1, 1, 1]} : vector<1x8x8xf32> to vector<1x8x1xf32>
    %75 = vector.extract_strided_slice %62 {offsets = [0, 2, 0], sizes = [1, 1, 128], strides = [1, 1, 1]} : vector<1x8x128xf32> to vector<1x1x128xf32>
    %76 = vector.broadcast %74 : vector<1x8x1xf32> to vector<1x8x128xf32>
    %77 = vector.broadcast %75 : vector<1x1x128xf32> to vector<1x8x128xf32>
    %78 = arith.mulf %76, %77 : vector<1x8x128xf32>
    %79 = arith.addf %73, %78 : vector<1x8x128xf32>
    %80 = vector.extract_strided_slice %0 {offsets = [0, 0, 3], sizes = [1, 8, 1], strides = [1, 1, 1]} : vector<1x8x8xf32> to vector<1x8x1xf32>
    %81 = vector.extract_strided_slice %62 {offsets = [0, 3, 0], sizes = [1, 1, 128], strides = [1, 1, 1]} : vector<1x8x128xf32> to vector<1x1x128xf32>
    %82 = vector.broadcast %80 : vector<1x8x1xf32> to vector<1x8x128xf32>
    %83 = vector.broadcast %81 : vector<1x1x128xf32> to vector<1x8x128xf32>
    %84 = arith.mulf %82, %83 : vector<1x8x128xf32>
    %85 = arith.addf %79, %84 : vector<1x8x128xf32>
    %86 = vector.extract_strided_slice %0 {offsets = [0, 0, 4], sizes = [1, 8, 1], strides = [1, 1, 1]} : vector<1x8x8xf32> to vector<1x8x1xf32>
    %87 = vector.extract_strided_slice %62 {offsets = [0, 4, 0], sizes = [1, 1, 128], strides = [1, 1, 1]} : vector<1x8x128xf32> to vector<1x1x128xf32>
    %88 = vector.broadcast %86 : vector<1x8x1xf32> to vector<1x8x128xf32>
    %89 = vector.broadcast %87 : vector<1x1x128xf32> to vector<1x8x128xf32>
    %90 = arith.mulf %88, %89 : vector<1x8x128xf32>
    %91 = arith.addf %85, %90 : vector<1x8x128xf32>
    %92 = vector.extract_strided_slice %0 {offsets = [0, 0, 5], sizes = [1, 8, 1], strides = [1, 1, 1]} : vector<1x8x8xf32> to vector<1x8x1xf32>
    %93 = vector.extract_strided_slice %62 {offsets = [0, 5, 0], sizes = [1, 1, 128], strides = [1, 1, 1]} : vector<1x8x128xf32> to vector<1x1x128xf32>
    %94 = vector.broadcast %92 : vector<1x8x1xf32> to vector<1x8x128xf32>
    %95 = vector.broadcast %93 : vector<1x1x128xf32> to vector<1x8x128xf32>
    %96 = arith.mulf %94, %95 : vector<1x8x128xf32>
    %97 = arith.addf %91, %96 : vector<1x8x128xf32>
    %98 = vector.extract_strided_slice %0 {offsets = [0, 0, 6], sizes = [1, 8, 1], strides = [1, 1, 1]} : vector<1x8x8xf32> to vector<1x8x1xf32>
    %99 = vector.extract_strided_slice %62 {offsets = [0, 6, 0], sizes = [1, 1, 128], strides = [1, 1, 1]} : vector<1x8x128xf32> to vector<1x1x128xf32>
    %100 = vector.broadcast %98 : vector<1x8x1xf32> to vector<1x8x128xf32>
    %101 = vector.broadcast %99 : vector<1x1x128xf32> to vector<1x8x128xf32>
    %102 = arith.mulf %100, %101 : vector<1x8x128xf32>
    %103 = arith.addf %97, %102 : vector<1x8x128xf32>
    %104 = vector.extract_strided_slice %0 {offsets = [0, 0, 7], sizes = [1, 8, 1], strides = [1, 1, 1]} : vector<1x8x8xf32> to vector<1x8x1xf32>
    %105 = vector.extract_strided_slice %62 {offsets = [0, 7, 0], sizes = [1, 1, 128], strides = [1, 1, 1]} : vector<1x8x128xf32> to vector<1x1x128xf32>
    %106 = vector.broadcast %104 : vector<1x8x1xf32> to vector<1x8x128xf32>
    %107 = vector.broadcast %105 : vector<1x1x128xf32> to vector<1x8x128xf32>
    %108 = arith.mulf %106, %107 : vector<1x8x128xf32>
    %109 = arith.addf %103, %108 : vector<1x8x128xf32>
    %110 = vector.shape_cast %109 : vector<1x8x128xf32> to vector<8x128xf32>
    %cst_13 = arith.constant dense<0.000000e+00> : vector<8x128xf32>
    %111 = tpu.matmul %110, %1, %cst_13 {dimension_numbers = #tpu.dot_dimension_numbers<[1], [0], [0], [1], [0, 0, 1, 1], [], []>} : vector<8x128xf32>, vector<128x128xf32>, vector<8x128xf32> -> vector<8x128xf32>
    %cst_14 = arith.constant dense<0.000000e+00> : vector<8x128xf32>
    %112 = tpu.matmul %61, %2, %cst_14 {dimension_numbers = #tpu.dot_dimension_numbers<[1], [0], [0], [1], [0, 0, 1, 1], [], []>} : vector<8x128xf32>, vector<128x128xf32>, vector<8x128xf32> -> vector<8x128xf32>
    %113 = arith.addf %111, %112 : vector<8x128xf32>
    %114 = vector.broadcast %3 : vector<1x128xf32> to vector<8x128xf32>
    %115 = arith.addf %113, %114 : vector<8x128xf32>
    %cst_15 = arith.constant 0.000000e+00 : f32
    %116 = vector.broadcast %cst_15 : f32 to vector<8x128xf32>
    %117 = arith.maximumf %115, %116 : vector<8x128xf32>
    %118 = vector.shape_cast %117 : vector<8x128xf32> to vector<1x8x128xf32>
    %c0_16 = arith.constant 0 : index
    %c0_17 = arith.constant 0 : index
    %c0_18 = arith.constant 0 : index
    %119 = vector.load %arg6[%c0_16, %c0_17, %c0_18] : memref<1x8x128xf32, #tpu.memory_space<vmem>>, vector<1x8x128xf32>
    tpu.vector_store %arg6[%c0_16, %c0_17, %c0_18], %118 {strides = array<i32>} : memref<1x8x128xf32, #tpu.memory_space<vmem>>, vector<1x8x128xf32>,
    return
  }
  func.func @transform_0(%arg0: i32) -> (i32, i32, i32) {
    %c0_i32 = arith.constant 0 : i32
    %c0_i32_0 = arith.constant 0 : i32
    %c0_i32_1 = arith.constant 0 : i32
    return %arg0, %c0_i32, %c0_i32_0 : i32, i32, i32
  }
  func.func @transform_1(%arg0: i32) -> (i32, i32, i32) {
    %c0_i32 = arith.constant 0 : i32
    %c0_i32_0 = arith.constant 0 : i32
    %c0_i32_1 = arith.constant 0 : i32
    return %arg0, %c0_i32, %c0_i32_0 : i32, i32, i32
  }
  func.func @transform_2(%arg0: i32) -> (i32, i32) {
    %c0_i32 = arith.constant 0 : i32
    %c0_i32_0 = arith.constant 0 : i32
    %c0_i32_1 = arith.constant 0 : i32
    return %c0_i32, %c0_i32_0 : i32, i32
  }
  func.func @transform_3(%arg0: i32) -> (i32, i32) {
    %c0_i32 = arith.constant 0 : i32
    %c0_i32_0 = arith.constant 0 : i32
    %c0_i32_1 = arith.constant 0 : i32
    return %c0_i32, %c0_i32_0 : i32, i32
  }
  func.func @transform_4(%arg0: i32) -> (i32, i32) {
    %c0_i32 = arith.constant 0 : i32
    %c0_i32_0 = arith.constant 0 : i32
    %c0_i32_1 = arith.constant 0 : i32
    return %c0_i32, %c0_i32_0 : i32, i32
  }
  func.func @transform_5(%arg0: i32) -> (i32, i32, i32) {
    %c0_i32 = arith.constant 0 : i32
    %c0_i32_0 = arith.constant 0 : i32
    %c0_i32_1 = arith.constant 0 : i32
    return %arg0, %c0_i32, %c0_i32_0 : i32, i32, i32
  }
}

</mosaic_0001>

<bundles_post_ra>
// kernel: tpu_custom_call.1
= control target key start
LH: loop header
LB: loop body
LE: loop exit
PB: predicated region body
PF: predicated region fallthrough
CT: control target
= control target key end

     0   :  { %s1970_s0 = inlined_call_operand.hbm [shape: f32[2,8,8], index: 0, kind: input, shape index: {}]   ;;  %s1971_s1 = inlined_call_operand.hbm [shape: f32[2,8,128], index: 1, kind: input, shape index: {}]   ;;  %s1972_s2 = inlined_call_operand.hbm [shape: f32[128,128], index: 2, kind: input, shape index: {}]   ;;  %s1973_s3 = inlined_call_operand.hbm [shape: f32[128,128], index: 3, kind: input, shape index: {}]   ;;  %s1974_s4 = inlined_call_operand.vmem [shape: f32[1,128], index: 4, kind: input, shape index: {}]   ;;  %s1975_s5 = inlined_call_operand.hbm [shape: f32[2,8,128], index: 5, kind: output, shape index: {}]  }
   0x1   :  { %1980 = sst [smem:[#allocation16_spill]] %s1972_s2 }
   0x2   :  { %1981 = sst [smem:[#allocation17_spill]] %s1973_s3 }
   0x3   :  { %10 = vsyncpa [#allocation3], 0 }
   0x4   :  { %12 = vsyncpa [#allocation3 + $0x1], 0 }
   0x5   :  { %13 = vsyncpa [#allocation6], 0 }
   0x6   :  { %15 = vsyncpa [#allocation6 + $0x1], 0 }
   0x7   :  { %16 = vsyncpa [#allocation9], 0 }
   0x8   :  { %17 = vsyncpa [#allocation4], 0 }
   0x9   :  { %19 = vsyncpa [#allocation4 + $0x1], 0  ;;  %s1547_s18 = smov 0   ;;  %s1549_s19 = smov 0  }
   0xa   :  { %s1551_s20 = smov 0   ;;  %s1553_s21 = smov 0  }
   0xb LB: > { %s1568_s22 = sadd.s32 4294967295, %s1497_s21   ;;  %s885_s23 = sadd.s32 4294967294, %s1497_s21   ;;  %s1497_s21 = sphi %s1553_s21, %s2003_s21   ;;  %s1493_s20 = sphi %s1551_s20, %s2002_s20   ;;  %s1489_s19 = sphi %s1549_s19, %s2001_s19   ;;  %s1485_s18 = sphi %s1547_s18, %s2000_s18  }
   0xc   : > { %p45_p0 = scmp.ne.s32.totalorder %s1489_s19, %s1485_s18  ;;  %p1976_p1 = scmp.eq.s32.totalorder %s1568_s22, 0 }
   0xd   : > { %p164_p3 = scmp.eq.s32.totalorder %s885_s23, 1  ;;  %p886_p5 = scmp.ge.s32.totalorder %s1497_s21, 1 }
   0xe   : > { %p1577_p4 = por %p1976_p1, %p45_p0  ;;  %p171_p7 = scmp.lt.s32.totalorder %s1497_s21, 3 }
   0xf   : > { %p1582_p6 = por %p164_p3, %p45_p0  ;;  %s1499_s27 = smov [#allocation7]  }
  0x10   : > { %s1982_s24 = scalar_select %p1577_p4, 1, 0 }
  0x11   : > { %s1983_s25 = scalar_select %p1582_p6, 1, 0 }
  0x12   : > { %p1587_p8 = pnand %p886_p5, %p171_p7  ;;  %s183_s28 = sshll.u32 %s1499_s27, 4  ;;  %s1591_s28 = int_to_ptr.vmem [resolvable:$true] %s183_s28 }
  0x13   : > { %s1500_s30 = smov [#allocation8]   ;;  %s1986_s2 = sld [smem:[#allocation16_spill]] }
  0x14   : > { %s1984_s26 = scalar_select %p1587_p8, 1, 0 }
  0x15   : > { %p1223_p9 = pneg %p1587_p8  ;;  %s196_s6 = sshll.u32 %s1500_s30, 4  ;;  %s1602_s6 = int_to_ptr.vmem [resolvable:$true] %s196_s6 }
  0x17   : > { %p1598_p11 = pnand %p1223_p9, %p1976_p1 }
  0x19   : > { %s1303_s9 = scalar_lea.hbm %s1986_s2, 2048  ;;  %p1305_p13 = pneg %p1598_p11 }
  0x1a   : > { %p1304_p12 = scmp.ne.s32.totalorder %s1986_s2, %s1303_s9  ;;  %p1310_p5 = scmp.lt.u32.totalorder %s1303_s9, %s1986_s2 }
  0x1c   : > { %p1306_p0 = pnand %p1305_p13, %p1304_p12 }
  0x1e   : > { %p1307_p3 = pneg %p1306_p0 }
  0x20   : > { %p1312_p7 = pnand %p1310_p5, %p1307_p3 }
  0x22   : > { %1315 = shalt.err (!%p1312_p7)
}
  0x23   : > { %s1316_s14 = scalar_lea.vmem %s1591_s28, 2048  ;;  %p1324_p2 = scmp.lt.s32.totalorder %s1591_s28, %s1591_s28 }
  0x24   : > { %p1317_p9 = scmp.ne.s32.totalorder %s1591_s28, %s1316_s14  ;;  %p1325_p12 = scmp.lt.s32.totalorder %s1316_s14, %s1316_s14 }
  0x26   : > { %p1319_p10 = pnand %p1317_p9, %p1305_p13  ;;  %p1326_p0 = por %p1325_p12, %p1324_p2 }
  0x28   : > { %p1320_p1 = pneg %p1319_p10 }
  0x2a   : > { %p1327_p6 = pnand %p1326_p0, %p1320_p1 }
  0x2c   : > { %1330 = shalt.err (!%p1327_p6)
}
  0x2d   : > { %s1501_s15 = smov 128   ;;  %s1502_s16 = smov 8  }
  0x2e   : > { %1226 = dma.hbm_to_vmem [thread:$0]  (!%p1598_p11), %s1986_s2, 2048, %s1591_s28, [#allocation6], %s1501_s15, %s1501_s15, %s1502_s16  }
  0x2f   : > { %s1987_s3 = sld [smem:[#allocation17_spill]] }
  0x35   : > { %s1331_s7 = scalar_lea.hbm %s1987_s3, 2048 }
  0x36   : > { %p1332_p2 = scmp.ne.s32.totalorder %s1987_s3, %s1331_s7  ;;  %p1338_p10 = scmp.lt.u32.totalorder %s1331_s7, %s1987_s3 }
  0x38   : > { %p1334_p1 = pnand %p1332_p2, %p1305_p13 }
  0x3a   : > { %p1335_p6 = pneg %p1334_p1 }
  0x3c   : > { %p1340_p3 = pnand %p1338_p10, %p1335_p6 }
  0x3e   : > { %1343 = shalt.err (!%p1340_p3)
}
  0x3f   : > { %s1344_s28 = scalar_lea.vmem %s1602_s6, 2048  ;;  %p1352_p12 = scmp.lt.s32.totalorder %s1602_s6, %s1602_s6 }
  0x40   : > { %p1345_p5 = scmp.ne.s32.totalorder %s1602_s6, %s1344_s28  ;;  %p1353_p0 = scmp.lt.s32.totalorder %s1344_s28, %s1344_s28 }
  0x42   : > { %p1347_p7 = pnand %p1345_p5, %p1305_p13  ;;  %p1354_p2 = por %p1353_p0, %p1352_p12 }
  0x44   : > { %p1348_p9 = pneg %p1347_p7 }
  0x46   : > { %p1355_p1 = pnand %p1354_p2, %p1348_p9 }
  0x48   : > { %1358 = shalt.err (!%p1355_p1)
}
  0x49   : > { %1229 = dma.hbm_to_vmem [thread:$0]  (!%p1598_p11), %s1987_s3, 2048, %s1602_s6, [#allocation9], %s1501_s15, %s1501_s15, %s1502_s16  }
  0x4a   : > { %s1657_s14 = sadd.s32 1, %s1497_s21   ;;  %s32_s29 = sadd.s32 1, %s1493_s20 }
  0x4b   : > { %s29_s17 = ssub.s32 %s1497_s21, %s1657_s14  ;;  %p39_p13 = scmp.ne.s32.totalorder %s1493_s20, %s1489_s19 }
  0x4c   : > { %p30_p6 = scmp.eq.s32.totalorder %s29_s17, 0  ;;  %p40_p10 = scmp.eq.s32.totalorder %s1497_s21, 0 }
  0x4d   : > { %p1988_p3 = scmp.eq.s32.totalorder %s1568_s22, 1  ;;  %p1243_p7 = scmp.lt.s32.totalorder %s1497_s21, 2 }
  0x4e   : > { %s1673_s27 = scalar_select %p30_p6, %s1493_s20, %s32_s29  }
  0x4f   : > { %p1667_p5 = por %p1988_p3, %p39_p13  ;;  %p41_p9 = por %p40_p10, %p39_p13 }
  0x50   : > { %s213_s30 = sand.u32 1, %s1493_s20   ;;  %s891_s15 = sshll.u32 %s1497_s21, 7 }
  0x51   : > { %s1989_s23 = scalar_select %p1667_p5, 1, 0 }
  0x52   : > { %s1676_s6 = sshll.u32 %s213_s30, 3  ;;  %s1682_s8 = scalar_lea.hbm %s1970_s0, %s891_s15 }
  0x53   : > { %s217_s9 = scalar_lea.vmem [#allocation2], %s1676_s6  ;;  %p1687_p11 = pnand %p1243_p7, %p41_p9 }
  0x54   : > { %s224_s10 = sshll.u32 %s217_s9, 4  ;;  %s1694_s13 = scalar_lea.hbm %s1971_s1, %s891_s15  ;;  %s1685_s10 = int_to_ptr.vmem [resolvable:$true] %s224_s10 }
  0x55   : > { %s231_s29 = sand.u32 1, %s1497_s21   ;;  %s214_s17 = scalar_lea.sflag [#allocation3], %s213_s30 }
  0x56   : > { %s1359_s16 = scalar_lea.hbm %s1682_s8, 128  ;;  %p1361_p0 = pneg %p1687_p11 }
  0x57   : > { %p1360_p12 = scmp.ne.s32.totalorder %s1682_s8, %s1359_s16  ;;  %s1364_s2 = scalar_lea.hbm %s1970_s0, 256 }
  0x58   : > { %p1365_p13 = scmp.lt.u32.totalorder %s1682_s8, %s1970_s0  ;;  %p1366_p6 = scmp.lt.u32.totalorder %s1364_s2, %s1359_s16 }
  0x59   : > { %p1362_p2 = pnand %p1361_p0, %p1360_p12  ;;  %p1368_p3 = scmp.lt.u32.totalorder %s1359_s16, %s1682_s8 }
  0x5a   : > { %p1367_p10 = por %p1366_p6, %p1365_p13 }
  0x5b   : > { %p1363_p1 = pneg %p1362_p2 }
  0x5c   : > { %p1369_p7 = por %p1368_p3, %p1367_p10 }
  0x5e   : > { %p1370_p9 = pnand %p1369_p7, %p1363_p1 }
  0x60   : > { %1373 = shalt.err (!%p1370_p9)
}
  0x61   : > { %s1374_s30 = scalar_lea.vmem %s1685_s10, 128  ;;  %s1503_s15 = smov [#allocation2]  }
  0x62   : > { %p1375_p12 = scmp.ne.s32.totalorder %s1685_s10, %s1374_s30  ;;  %s1379_s12 = sshll.u32 %s1503_s15, 4  ;;  %s1380_s12 = int_to_ptr.vmem [resolvable:$false] %s1379_s12 }
  0x63   : > { %s1381_s3 = scalar_lea.vmem %s1380_s12, 256  ;;  %p1382_p4 = scmp.lt.s32.totalorder %s1685_s10, %s1380_s12 }
  0x64   : > { %p1377_p2 = pnand %p1375_p12, %p1361_p0  ;;  %p1383_p13 = scmp.lt.s32.totalorder %s1381_s3, %s1374_s30 }
  0x66   : > { %p1378_p5 = pneg %p1377_p2  ;;  %p1384_p6 = por %p1383_p13, %p1382_p4 }
  0x68   : > { %p1385_p10 = pnand %p1384_p6, %p1378_p5 }
  0x6a   : > { %1388 = shalt.err (!%p1385_p10)
}
  0x6b   : > { %1233 = dma.hbm_to_vmem [thread:$0]  (!%p1687_p11), %s1682_s8, 128, %s1685_s10, %s214_s17  }
  0x6c   : > { %s235_s2 = scalar_lea.vmem [#allocation5], %s1676_s6  ;;  %s232_s7 = scalar_lea.sflag [#allocation6], %s231_s29 }
  0x6d   : > { %s242_s16 = sshll.u32 %s235_s2, 4  ;;  %s1389_s9 = scalar_lea.hbm %s1694_s13, 128  ;;  %s243_s16 = int_to_ptr.vmem [resolvable:$true] %s242_s16 }
  0x6e   : > { %p1390_p4 = scmp.ne.s32.totalorder %s1694_s13, %s1389_s9  ;;  %s1394_s15 = scalar_lea.hbm %s1971_s1, 256 }
  0x6f   : > { %p1395_p3 = scmp.lt.u32.totalorder %s1694_s13, %s1971_s1  ;;  %p1396_p7 = scmp.lt.u32.totalorder %s1394_s15, %s1389_s9 }
  0x70   : > { %p1392_p5 = pnand %p1390_p4, %p1361_p0  ;;  %p1398_p12 = scmp.lt.u32.totalorder %s1389_s9, %s1694_s13 }
  0x71   : > { %p1397_p9 = por %p1396_p7, %p1395_p3 }
  0x72   : > { %p1393_p1 = pneg %p1392_p5 }
  0x73   : > { %p1399_p2 = por %p1398_p12, %p1397_p9 }
  0x75   : > { %p1400_p13 = pnand %p1399_p2, %p1393_p1 }
  0x77   : > { %1403 = shalt.err (!%p1400_p13)
}
  0x78   : > { %s1404_s6 = scalar_lea.vmem %s243_s16, 128  ;;  %s1504_s8 = smov [#allocation5]  }
  0x79   : > { %p1405_p6 = scmp.ne.s32.totalorder %s243_s16, %s1404_s6  ;;  %s1409_s10 = sshll.u32 %s1504_s8, 4  ;;  %s1410_s10 = int_to_ptr.vmem [resolvable:$false] %s1409_s10 }
  0x7a   : > { %s1411_s29 = scalar_lea.vmem %s1410_s10, 256  ;;  %p1412_p5 = scmp.lt.s32.totalorder %s243_s16, %s1410_s10 }
  0x7b   : > { %p1407_p10 = pnand %p1405_p6, %p1361_p0  ;;  %p1413_p8 = scmp.lt.s32.totalorder %s1411_s29, %s1404_s6 }
  0x7d   : > { %p1408_p4 = pneg %p1407_p10  ;;  %p1414_p3 = por %p1413_p8, %p1412_p5 }
  0x7f   : > { %p1415_p7 = pnand %p1414_p3, %p1408_p4 }
  0x81   : > { %1418 = shalt.err (!%p1415_p7)
}
  0x82   : > { %1236 = dma.hbm_to_vmem [thread:$0]  (!%p1687_p11), %s1694_s13, 128, %s243_s16, %s232_s7  }
  0x83   : > { %p1991_p1 = scmp.ne.s32.totalorder %s1984_s26, 0 }
  0x84   : > { %s1747_s17 = sand.u32 (!%p1991_p1), 1, %s1489_s19   ;;  %p1992_p8 = scmp.ne.s32.totalorder (!%p1991_p1), %s1982_s24, 0 }
  0x85   : > { %251 = sbr.rel (%p1991_p1) target bundleno = 774 (0x306), region = 40  ;;  %s1750_s2 = sshll.u32 (!%p1991_p1), %s1747_s17, 3 }
  0x86   : > { %s254_s9 = scalar_lea.sflag (!%p1991_p1), [#allocation3], %s1747_s17  ;;  %s257_s28 = scalar_lea.vmem (!%p1991_p1), [#allocation2], %s1750_s2 }
  0x8c   : > { %1464 = dma.done.wait (%p1992_p8), %s254_s9, 128  }
  0x8d   : > { %1466 = vsyncadd (%p1992_p8), %s254_s9, 4294967168  ;;  %s262_s26 = sand.u32 1, %s1568_s22   ;;  %s266_s13 = scalar_lea.vmem [#allocation5], %s1750_s2 }
  0x8e   : > { %s263_s11 = scalar_lea.sflag [#allocation6], %s262_s26 }
  0x8f   : > { %1468 = dma.done.wait (%p1992_p8), %s263_s11, 128  }
  0x90   : > { %1470 = vsyncadd (%p1992_p8), %s263_s11, 4294967168  ;;  %p1993_p11 = scmp.eq.s32.totalorder %s1568_s22, 0 }
  0x92   : > { %1472 = dma.done.wait (%p1993_p11), [#allocation6], 2048   ;;  %p1994_p0 = pmov %p1993_p11 }
  0x94   : > { %1474 = vsyncadd (%p1994_p0), [#allocation6], 4294965248  ;;  %p1995_p9 = pmov %p1994_p0 }
  0x95   : > { %p1996_p12 = pmov %p1994_p0 }
  0x96   : > { %1476 = dma.done.wait (%p1995_p9), [#allocation9], 2048  }
  0x97   : > { %1478 = vsyncadd (%p1996_p12), [#allocation9], 4294965248  ;;  %v1505_v0 = vmov 2   ;;  %v1506_v1 = vmov 0   ;;  %v1507_v2 = vmov 0.0|0.0   ;;  %v1774_v3 = vld [vmem:[%s257_s28] sm:$0xff]  ;;  %v346_v60 = vlaneseq }
  0x98   : > { %1296 = vset.pattern.permute.xlu1 %v1505_v0  ;;  %1294 = vset.pattern.permute.xlu0 %v1506_v1  ;;  %v323_v4 = vld [vmem:[#allocation8] sm:$0xff]  ;;  %v324_v5 = vld [vmem:[#allocation8 + $0x8] sm:$0xff]  ;;  %v325_v9 = vld [vmem:[#allocation8 + $0x10] sm:$0xff]  ;;  %v1508_v17 = vmov 3   ;;  %v1509_v18 = vmov 1   ;;  %v1510_v26 = vmov 4  }
  0x99   : > { %1113 = vmatprep.subr.bf16.mxu0 %v1507_v2  ;;  %1137 = vmatprep.subr.bf16.mxu1 %v1507_v2  ;;  %v1778_v6 = vpack.c.bf16 %v324_v5, %v323_v4  ;;  %v307_v7 = vld [vmem:[#allocation7] sm:$0xff]  ;;  %v308_v8 = vld [vmem:[#allocation7 + $0x8] sm:$0xff]  ;;  %v326_v11 = vld [vmem:[#allocation8 + $0x18] sm:$0xff]  ;;  %v1511_v27 = vmov 5   ;;  %v1512_v36 = vmov 6   ;;  %v1513_v37 = vmov 7  }
  0x9a   : > { %362 = vperm.xlu1 %1296, %v1774_v3   ;;  %343 = vperm.xlu0 %1294, %v1774_v3   ;;  %v1780_v10 = vpack.c.bf16 %v308_v8, %v307_v7  ;;  %v309_v12 = vld [vmem:[#allocation7 + $0x10] sm:$0xff]  ;;  %v310_v13 = vld [vmem:[#allocation7 + $0x18] sm:$0xff]  ;;  %v1783_v14 = vpack.c.bf16 %v326_v11, %v325_v9  ;;  %v327_v16 = vld [vmem:[#allocation8 + $0x20] sm:$0xff]  ;;  %vm1514_vm0 = vmmov 0   ;;  %v1515_v50 = vmov 0.0   ;;  %s902_s7 = sshll.u32 %s1568_s22, 7 }
  0x9b   : > { %1115 = vmatpush3.bf16.msra.mxu0 %v1778_v6  ;;  %v1787_v15 = vpack.c.bf16 %v310_v13, %v309_v12  ;;  %v328_v19 = vld [vmem:[#allocation8 + $0x28] sm:$0xff]  ;;  %v311_v20 = vld [vmem:[#allocation7 + $0x20] sm:$0xff]  ;;  %v329_v24 = vld [vmem:[#allocation8 + $0x30] sm:$0xff]  ;;  %1005 = vmatprep.mubr.msk.f32.mxu0 %vm1514_vm0, %v1515_v50  ;;  %v1855_v61 = vshrl.u32 %v346_v60, 7  ;;  %s305_s30 = scalar_lea.vmem [#allocation10], %s1750_s2  ;;  %s1926_s6 = scalar_lea.hbm %s1975_s5, %s902_s7 }
  0x9c   : > { %1139 = vmatpush3.bf16.msra.mxu1 %v1780_v10  ;;  %1116 = vmatprep.subr.bf16.mxu0 %v1507_v2  ;;  %v312_v21 = vld [vmem:[#allocation7 + $0x28] sm:$0xff]  ;;  %v1795_v22 = vpack.c.bf16 %v328_v19, %v327_v16  ;;  %v330_v25 = vld [vmem:[#allocation8 + $0x38] sm:$0xff]  ;;  %v313_v28 = vld [vmem:[#allocation7 + $0x30] sm:$0xff]  ;;  %s773_s15 = sshll.u32 %s305_s30, 4  ;;  %s760_s8 = scalar_lea.sflag [#allocation4], %s1747_s17  ;;  %s1928_s15 = int_to_ptr.vmem [resolvable:$true] %s773_s15 }
  0x9d   : > { %1140 = vmatprep.subr.bf16.mxu1 %v1507_v2  ;;  %v1797_v23 = vpack.c.bf16 %v312_v21, %v311_v20  ;;  %v314_v29 = vld [vmem:[#allocation7 + $0x38] sm:$0xff]  ;;  %v1804_v30 = vpack.c.bf16 %v330_v25, %v329_v24  ;;  %v331_v32 = vld [vmem:[#allocation8 + $0x40] sm:$0xff]  ;;  %v332_v33 = vld [vmem:[#allocation8 + $0x48] sm:$0xff]  ;;  %1040 = vmatprep.mubr.msk.f32.mxu1 %vm1514_vm0, %v1515_v50  ;;  %v348_v62 = vsub.s32 0, %v1855_v61  ;;  %v357_v63 = vsub.s32 1, %v1855_v61  ;;  %s1419_s10 = scalar_lea.vmem %s1928_s15, 128 }
  0x9e   : > { %1297 = vset.pattern.permute.xlu1 %v1508_v17  ;;  %1295 = vset.pattern.permute.xlu0 %v1509_v18  ;;  %v1808_v31 = vpack.c.bf16 %v314_v29, %v313_v28  ;;  %v315_v34 = vld [vmem:[#allocation7 + $0x40] sm:$0xff]  ;;  %v316_v35 = vld [vmem:[#allocation7 + $0x48] sm:$0xff]  ;;  %v1126_v38 = vpack.c.bf16 %v332_v33, %v331_v32  ;;  %v333_v40 = vld [vmem:[#allocation8 + $0x50] sm:$0xff]  ;;  %v367_v0 = vsub.s32 2, %v1855_v61  ;;  %v377_v5 = vsub.s32 3, %v1855_v61  ;;  %p1420_p2 = scmp.ne.s32.totalorder %s1928_s15, %s1419_s10  ;;  %p1997_p13 = scmp.ne.s32.totalorder %s1989_s23, 0 }
  0x9f   : > { %372 = vperm.xlu1 %1297, %v1774_v3   ;;  %352 = vperm.xlu0 %1295, %v1774_v3   ;;  %v1814_v39 = vpack.c.bf16 %v316_v35, %v315_v34  ;;  %v334_v41 = vld [vmem:[#allocation8 + $0x58] sm:$0xff]  ;;  %v317_v42 = vld [vmem:[#allocation7 + $0x50] sm:$0xff]  ;;  %v335_v46 = vld [vmem:[#allocation8 + $0x60] sm:$0xff]  ;;  %v387_v7 = vsub.s32 4, %v1855_v61  ;;  %v397_v12 = vsub.s32 5, %v1855_v61  ;;  %v407_v21 = vsub.s32 6, %v1855_v61 }
  0xa0   : > { %1118 = vmatpush3.bf16.msra.mxu0 %v1783_v14  ;;  %1142 = vmatpush3.bf16.msra.mxu1 %v1787_v15  ;;  %v318_v43 = vld [vmem:[#allocation7 + $0x58] sm:$0xff]  ;;  %v1129_v44 = vpack.c.bf16 %v334_v41, %v333_v40  ;;  %v336_v47 = vld [vmem:[#allocation8 + $0x68] sm:$0xff]  ;;  %v319_v48 = vld [vmem:[#allocation7 + $0x60] sm:$0xff]  ;;  %v417_v32 = vsub.s32 7, %v1855_v61  ;;  %p1421_p6 = pnand %p1420_p2, %p1997_p13  ;;  %s1516_s22 = smov [#allocation10]  }
  0xa1   : > { %1119 = vmatprep.subr.bf16.mxu0 %v1507_v2  ;;  %1143 = vmatprep.subr.bf16.mxu1 %v1507_v2  ;;  %v1819_v45 = vpack.c.bf16 %v318_v43, %v317_v42  ;;  %v320_v49 = vld [vmem:[#allocation7 + $0x68] sm:$0xff]  ;;  %v1132_v51 = vpack.c.bf16 %v336_v47, %v335_v46  ;;  %v337_v53 = vld [vmem:[#allocation8 + $0x70] sm:$0xff]  ;;  %v338_v54 = vld [vmem:[#allocation8 + $0x78] sm:$0xff]  ;;  %s1423_s29 = sshll.u32 %s1516_s22, 4  ;;  %s1424_s29 = int_to_ptr.vmem [resolvable:$false] %s1423_s29 }
  0xa2   : > { %v1829_v52 = vpack.c.bf16 %v320_v49, %v319_v48  ;;  %v321_v55 = vld [vmem:[#allocation7 + $0x70] sm:$0xff]  ;;  %v322_v56 = vld [vmem:[#allocation7 + $0x78] sm:$0xff]  ;;  %v1135_v57 = vpack.c.bf16 %v338_v54, %v337_v53  ;;  %p1422_p10 = pneg %p1421_p6  ;;  %s1425_s2 = scalar_lea.vmem %s1424_s29, 256 }
  0xa3   : > { %1298 = vset.pattern.permute.xlu1 %v1510_v26  ;;  %1299 = vset.pattern.permute.xlu0 %v1511_v27  ;;  %v1834_v58 = vpack.c.bf16 %v322_v56, %v321_v55  ;;  %v340_v59 = vld [vmem:[%s266_s13] sm:$0xff]  ;;  %p1426_p4 = scmp.lt.s32.totalorder %s1928_s15, %s1424_s29  ;;  %p1427_p5 = scmp.lt.s32.totalorder %s1425_s2, %s1419_s10 }
  0xa4   : > { %382 = vperm.xlu1 %1298, %v1774_v3   ;;  %392 = vperm.xlu0 %1299, %v1774_v3   ;;  %v349_v4 = vrot.slane %v340_v59, %v348_v62  ;;  %v368_v8 = vrot.slane %v340_v59, %v367_v0  ;;  %v388_v17 = vrot.slane %v340_v59, %v387_v7 }
  0xa5   : > { %1121 = vmatpush3.bf16.msra.mxu0 %v1795_v22  ;;  %1145 = vmatpush3.bf16.msra.mxu1 %v1797_v23  ;;  %v398_v20 = vrot.slane %v340_v59, %v397_v12  ;;  %p1428_p3 = por %p1427_p5, %p1426_p4 }
  0xa6   : > { %1122 = vmatprep.subr.bf16.mxu0 %v1507_v2  ;;  %1146 = vmatprep.subr.bf16.mxu1 %v1507_v2 }
  0xa7   : > { %p1429_p7 = pnand %p1428_p3, %p1422_p10 }
  0xa8   : > { %1300 = vset.pattern.permute.xlu1 %v1512_v36  ;;  %1302 = vset.pattern.permute.xlu0 %v1513_v37 }
  0xa9   : > { %402 = vperm.xlu1 %1300, %v1774_v3   ;;  %1124 = vmatpush3.bf16.msra.mxu0 %v1804_v30 }
  0xaa   : > { %1148 = vmatpush3.bf16.msra.mxu1 %v1808_v31  ;;  %1125 = vmatprep.subr.bf16.mxu0 %v1507_v2 }
  0xab   : > { %1149 = vmatprep.subr.bf16.mxu1 %v1507_v2 }
  0xad   : > { %1301 = vset.pattern.permute.xlu1 %v1513_v37  ;;  %1127 = vmatpush3.bf16.msra.mxu0 %v1126_v38  ;;  %v418_v37 = vrot.slane %v340_v59, %v417_v32 }
  0xae   : > { %412 = vperm.xlu1 %1301, %v1774_v3   ;;  %1151 = vmatpush3.bf16.msra.mxu1 %v1814_v39 }
  0xaf   : > { %1128 = vmatprep.subr.bf16.mxu0 %v1507_v2  ;;  %1152 = vmatprep.subr.bf16.mxu1 %v1507_v2 }
  0xb1   : > { %1130 = vmatpush3.bf16.msra.mxu0 %v1129_v44 }
  0xb2   : > { %1154 = vmatpush3.bf16.msra.mxu1 %v1819_v45  ;;  %1131 = vmatprep.subr.bf16.mxu0 %v1507_v2 }
  0xb3   : > { %1155 = vmatprep.subr.bf16.mxu1 %v1507_v2 }
  0xb5   : > { %1133 = vmatpush3.bf16.msra.mxu0 %v1132_v51 }
  0xb6   : > { %1157 = vmatpush3.bf16.msra.mxu1 %v1829_v52  ;;  %1134 = vmatprep.subr.bf16.mxu0 %v1507_v2 }
  0xb7   : > { %1158 = vmatprep.subr.bf16.mxu1 %v1507_v2 }
  0xb9   : > { %1136 = vmatpush3.bf16.msra.mxu0 %v1135_v57 }
  0xba   : > { %1160 = vmatpush3.bf16.msra.mxu1 %v1834_v58  ;;  %1161 = vmatprep.subr.bf16.mxu0 %v1507_v2 }
  0xbb   : > { %1185 = vmatprep.subr.bf16.mxu1 %v1507_v2 }
  0xbc   : > { %1006 = vmatmul.mubr.f32.vlgmr.msra.gmra.mrb[0].mxu0 %v340_v59 }
  0xbd   : > { %1163 = vmatpush3.bf16.msra.mxu0 %v1778_v6  ;;  %1075 = vmatprep.mubr.msk.f32.mxu0 %vm1514_vm0, %v1515_v50  ;;  %v358_v6 = vrot.slane %v340_v59, %v357_v63 }
  0xbe   : > { %1164 = vmatprep.subr.bf16.mxu0 %v1507_v2 }
  0xc1   : > { %1166 = vmatpush3.bf16.msra.mxu0 %v1783_v14  ;;  %v378_v14 = vrot.slane %v340_v59, %v377_v5 }
  0xc2   : > { %1167 = vmatprep.subr.bf16.mxu0 %v1507_v2 }
  0xc5   : > { %1169 = vmatpush3.bf16.msra.mxu0 %v1795_v22 }
  0xc6   : > { %1170 = vmatprep.subr.bf16.mxu0 %v1507_v2 }
  0xc9   : > { %1172 = vmatpush3.bf16.msra.mxu0 %v1804_v30  ;;  %v408_v30 = vrot.slane %v340_v59, %v407_v21 }
  0xca   : > { %1173 = vmatprep.subr.bf16.mxu0 %v1507_v2 }
  0xcd   : > { %1175 = vmatpush3.bf16.msra.mxu0 %v1126_v38 }
  0xce   : > { %1176 = vmatprep.subr.bf16.mxu0 %v1507_v2 }
  0xd1   : > { %1178 = vmatpush3.bf16.msra.mxu0 %v1129_v44 }
  0xd2   : > { %1179 = vmatprep.subr.bf16.mxu0 %v1507_v2 }
  0xd5   : > { %1181 = vmatpush3.bf16.msra.mxu0 %v1132_v51 }
  0xd6   : > { %1182 = vmatprep.subr.bf16.mxu0 %v1507_v2 }
  0xd9   : > { %1184 = vmatpush3.bf16.msra.mxu0 %v1135_v57 }
 0x119   : > { %v1860_v1 = vpop.permute.xlu1 %362  ;;  %v1862_v3 = vpop.permute.xlu0 %343 }
 0x11a   : > { %v350_v13 = vmul.f32 %v349_v4, %v1862_v3  ;;  %v369_v18 = vmul.f32 %v368_v8, %v1860_v1 }
 0x11e   : > { %v1872_v9 = vpop.permute.xlu1 %372  ;;  %v353_v11 = vpop.permute.xlu0 %352 }
 0x11f   : > { %v359_v16 = vmul.f32 %v358_v6, %v353_v11  ;;  %v379_v22 = vmul.f32 %v378_v14, %v1872_v9 }
 0x121   : > { %v360_v19 = vadd.f32 %v359_v16, %v350_v13 }
 0x123   : > { %v370_v24 = vadd.f32 %v369_v18, %v360_v19  ;;  %v383_v25 = vpop.permute.xlu1 %382  ;;  %v393_v26 = vpop.permute.xlu0 %392 }
 0x124   : > { %v389_v27 = vmul.f32 %v388_v17, %v383_v25  ;;  %v399_v29 = vmul.f32 %v398_v20, %v393_v26 }
 0x125   : > { %v380_v28 = vadd.f32 %v379_v22, %v370_v24 }
 0x127   : > { %v390_v33 = vadd.f32 %v389_v27, %v380_v28 }
 0x128   : > { %v403_v34 = vpop.permute.xlu1 %402 }
 0x129   : > { %v400_v35 = vadd.f32 %v399_v29, %v390_v33  ;;  %v409_v36 = vmul.f32 %v408_v30, %v403_v34 }
 0x12b   : > { %v410_v40 = vadd.f32 %v409_v36, %v400_v35 }
 0x12d   : > { %v413_v38 = vpop.permute.xlu1 %412 }
 0x12e   : > { %v419_v41 = vmul.f32 %v418_v37, %v413_v38 }
 0x130   : > { %v420_v42 = vadd.f32 %v419_v41, %v410_v40 }
 0x132   : > { %1041 = vmatmul.mubr.f32.vlgmr.msra.gmra.mrb[0].mxu1 %v420_v42 }
 0x133   : > { %1187 = vmatpush3.bf16.msra.mxu1 %v1780_v10  ;;  %1110 = vmatprep.mubr.msk.f32.mxu1 %vm1514_vm0, %v1515_v50 }
 0x134   : > { %1188 = vmatprep.subr.bf16.mxu1 %v1507_v2 }
 0x137   : > { %1190 = vmatpush3.bf16.msra.mxu1 %v1787_v15 }
 0x138   : > { %1191 = vmatprep.subr.bf16.mxu1 %v1507_v2 }
 0x13b   : > { %1193 = vmatpush3.bf16.msra.mxu1 %v1797_v23  ;;  %v900_v23 = vld [vmem:[%s1974_s4] ss:$0 sm:$0xff] }
 0x13c   : > { %1194 = vmatprep.subr.bf16.mxu1 %v1507_v2 }
 0x13f   : > { %1196 = vmatpush3.bf16.msra.mxu1 %v1808_v31 }
 0x140   : > { %1197 = vmatprep.subr.bf16.mxu1 %v1507_v2 }
 0x143   : > { %1199 = vmatpush3.bf16.msra.mxu1 %v1814_v39 }
 0x144   : > { %1200 = vmatprep.subr.bf16.mxu1 %v1507_v2 }
 0x147   : > { %1202 = vmatpush3.bf16.msra.mxu1 %v1819_v45 }
 0x148   : > { %1203 = vmatprep.subr.bf16.mxu1 %v1507_v2 }
 0x14b   : > { %1205 = vmatpush3.bf16.msra.mxu1 %v1829_v52 }
 0x14c   : > { %1206 = vmatprep.subr.bf16.mxu1 %v1507_v2 }
 0x14f   : > { %1208 = vmatpush3.bf16.msra.mxu1 %v1834_v58 }
 0x18f   : > { %v487_v10 = vpop.f32.mrb[0].mxu0 }
 0x190   : > { %v1007_v15 = vpop.f32.mrb[1].mxu0 }
 0x205   : > { %v557_v31 = vpop.f32.mrb[0].mxu1 }
 0x206   : > { %v558_v39 = vadd.f32 %v557_v31, %v487_v10  ;;  %v1042_v43 = vpop.f32.mrb[1].mxu1 }
 0x208   : > { %v567_v44 = vadd.f32 %v900_v23, %v558_v39 }
 0x20a   : > { %v568_v46 = vmax.f32 %v567_v44, 0.0 }
 0x20c   : > { %1076 = vmatmul.mubr.f32.vlgmr.msra.gmra.mrb[2].mxu0 %v568_v46  ;;  %v572_v45 = vrot.slane %v568_v46, %v348_v62  ;;  %v577_v2 = vrot.slane %v568_v46, %v357_v63  ;;  %v583_v47 = vrot.slane %v568_v46, %v367_v0  ;;  %v589_v50 = vrot.slane %v568_v46, %v377_v5 }
 0x20d   : > { %v595_v53 = vrot.slane %v568_v46, %v387_v7  ;;  %v601_v56 = vrot.slane %v568_v46, %v397_v12  ;;  %v607_v59 = vrot.slane %v568_v46, %v407_v21  ;;  %v613_v63 = vrot.slane %v568_v46, %v417_v32 }
 0x20e   : > { %v573_v48 = vmul.f32 %v572_v45, %v1862_v3  ;;  %v578_v49 = vmul.f32 %v577_v2, %v353_v11  ;;  %v584_v52 = vmul.f32 %v583_v47, %v1860_v1  ;;  %v590_v55 = vmul.f32 %v589_v50, %v1872_v9 }
 0x20f   : > { %v596_v58 = vmul.f32 %v595_v53, %v383_v25  ;;  %v602_v62 = vmul.f32 %v601_v56, %v393_v26  ;;  %v608_v3 = vmul.f32 %v607_v59, %v403_v34  ;;  %v614_v4 = vmul.f32 %v613_v63, %v413_v38 }
 0x210   : > { %v579_v51 = vadd.f32 %v578_v49, %v573_v48 }
 0x212   : > { %v585_v54 = vadd.f32 %v584_v52, %v579_v51 }
 0x214   : > { %v591_v57 = vadd.f32 %v590_v55, %v585_v54 }
 0x216   : > { %v597_v60 = vadd.f32 %v596_v58, %v591_v57 }
 0x218   : > { %v603_v0 = vadd.f32 %v602_v62, %v597_v60 }
 0x21a   : > { %v609_v1 = vadd.f32 %v608_v3, %v603_v0 }
 0x21c   : > { %v615_v5 = vadd.f32 %v614_v4, %v609_v1 }
 0x21e   : > { %1111 = vmatmul.mubr.f32.vlgmr.msra.gmra.mrb[2].mxu1 %v615_v5 }
 0x2df   : > { %v682_v6 = vpop.f32.mrb[2].mxu0 }
 0x2e0   : > { %v1077_v7 = vpop.f32.mrb[3].mxu0 }
 0x2f1   : > { %v752_v61 = vpop.f32.mrb[2].mxu1 }
 0x2f2   : > { %v753_v8 = vadd.f32 %v752_v61, %v682_v6  ;;  %v1112_v9 = vpop.f32.mrb[3].mxu1 }
 0x2f4   : > { %v756_v11 = vadd.f32 %v900_v23, %v753_v8 }
 0x2f6   : > { %v757_v12 = vmax.f32 %v756_v11, 0.0 }
 0x2f8   : > { %758 = vst [vmem:[%s305_s30] sm:$0xff] %v757_v12 }
 0x2f9   : > { %1432 = shalt.err (!%p1429_p7)
}
 0x2fa   : > { %s1433_s17 = scalar_lea.hbm %s1926_s6, 128  ;;  %s1437_s26 = scalar_lea.hbm %s1975_s5, 256 }
 0x2fb   : > { %p1434_p1 = scmp.ne.s32.totalorder %s1926_s6, %s1433_s17  ;;  %p1438_p0 = scmp.lt.u32.totalorder %s1926_s6, %s1975_s5 }
 0x2fc   : > { %p1439_p9 = scmp.lt.u32.totalorder %s1437_s26, %s1433_s17  ;;  %p1441_p2 = scmp.lt.u32.totalorder %s1433_s17, %s1926_s6 }
 0x2fd   : > { %p1435_p8 = pnand %p1434_p1, %p1997_p13 }
 0x2fe   : > { %p1440_p12 = por %p1439_p9, %p1438_p0 }
 0x2ff   : > { %p1436_p11 = pneg %p1435_p8 }
 0x300   : > { %p1442_p6 = por %p1441_p2, %p1440_p12 }
 0x302   : > { %p1443_p10 = pnand %p1442_p6, %p1436_p11 }
 0x304   : > { %1446 = shalt.err (!%p1443_p10)
}
 0x305   : > { %1221 = dma.vmem_to_hbm [thread:$0]  (%p1997_p13), %s1928_s15, 128, %s1926_s6, %s760_s8  }
 0x306 PF: > { %s785_s24 = sand.u32 1, %s1485_s18   ;;  %p1998_p4 = scmp.ne.s32.totalorder %s1983_s25, 0 }
 0x307   : > { %p1999_p5 = scmp.ge.s32.totalorder %s1497_s21, 2  ;;  %s786_s16 = scalar_lea.sflag [#allocation4], %s785_s24 }
 0x309   : > { %p1238_p3 = pnand %p1999_p5, %p1998_p4 }
 0x30b   : > { %1480 = dma.done.wait (!%p1238_p3), %s786_s16, 128  }
 0x30c   : > { %1482 = vsyncadd (!%p1238_p3), %s786_s16, 4294967168  ;;  %p22_p7 = scmp.ge.s32.totalorder %s1657_s14, 4   ;;  %s2000_s18 = smov %s1489_s19 }
 0x30d   : > { %s2001_s19 = smov %s1493_s20  ;;  %s2002_s20 = smov %s1673_s27 }
 0x30e   : > { %s2003_s21 = smov %s1657_s14  ;;  %24 = sbr.rel (!%p22_p7) target bundleno = 11 (0xb), region = 106 }
 0x315   :  { %791 = vsyncpa [#allocation3], 1 }
 0x316   :  { %793 = vsyncpa [#allocation3 + $0x1], 1 }
 0x317   :  { %794 = vsyncpa [#allocation6], 1 }
 0x318   :  { %796 = vsyncpa [#allocation6 + $0x1], 1 }
 0x319   :  { %797 = vsyncpa [#allocation9], 1 }
 0x31a   :  { %798 = vsyncpa [#allocation4], 1 }
 0x31b   :  { %800 = vsyncpa [#allocation4 + $0x1], 1 }

</bundles_post_ra>
